<compile_context>
chip_gen: v7x
topology: tpu7x:2x2x1
jax: 0.10.0
libtpu: 0.0.40
codegen_flags: <defaults>
</compile_context>

<pallas_src>
import jax
import jax.numpy as jnp
from jax.experimental import pallas as pl
from jax.experimental.pallas import tpu as pltpu


HIDDEN = 64          # logical hidden width (matches the PyTorch module)
H_PAD = 128          # hidden width padded to full lane width
OUT_PAD = 128        # lane-dense output width (mu | sigma | zero-pad)
LANE = 128
SUBLANE = 8
MAX_BATCH_TILE = 512  # rows per grid step (fits comfortably in scoped VMEM)


def _round_up(n, m):
    return ((n + m - 1) // m) * m


def _softplus(z):
    # Numerically stable softplus matching torch.nn.functional.softplus
    # (threshold=20: returns z for large z). One exp + one log1p on the EUP.
    return jnp.where(z > 20.0, z, jnp.log1p(jnp.exp(jnp.minimum(z, 20.0))))


def _make_actor_kernel(action_dim):
    def actor_kernel(x_ref, w1_ref, b1_ref, w2_ref, b2_ref, wh_ref, bh_ref,
                     out_ref):
        x = x_ref[...]

        # shared_net: Linear -> ReLU -> Linear -> ReLU (all 128-lane dense)
        h = jnp.dot(x, w1_ref[...], preferred_element_type=jnp.float32)
        h = jnp.maximum(h + b1_ref[...], 0.0)
        h = jnp.dot(h, w2_ref[...], preferred_element_type=jnp.float32)
        h = jnp.maximum(h + b2_ref[...], 0.0)

        # fused heads: one MXU matmul covers mu | sigma (| zero padding)
        z = jnp.dot(h, wh_ref[...], preferred_element_type=jnp.float32)
        z = z + bh_ref[...]

        # lane 0..action_dim-1  -> tanh               (mu head)
        # lane action_dim..     -> softplus + 1e-4    (sigma head; padded
        #                          lanes hold softplus(0)+1e-4 and are sliced
        #                          away by the wrapper)
        col = jax.lax.broadcasted_iota(jnp.int32, z.shape, 1)
        mu = jnp.tanh(z)
        sig = _softplus(z) + 0.0001
        out_ref[...] = jnp.where(col < action_dim, mu, sig).astype(out_ref.dtype)

    return actor_kernel


def pack_params(params, feature_dim, action_dim):
    """Zero-pad logical-shape params to lane-dense, MXU-friendly shapes and
    fuse the mu/sigma head weights into a single (H_PAD, OUT_PAD) matrix."""
    assert 2 * action_dim <= OUT_PAD, "action_dim too large for fused head"
    f_pad = _round_up(max(feature_dim, 1), LANE)

    w1 = jnp.zeros((f_pad, H_PAD), jnp.float32)
    w1 = w1.at[:feature_dim, :HIDDEN].set(params["w1"])
    b1 = jnp.zeros((1, H_PAD), jnp.float32).at[:, :HIDDEN].set(params["b1"])

    w2 = jnp.zeros((H_PAD, H_PAD), jnp.float32)
    w2 = w2.at[:HIDDEN, :HIDDEN].set(params["w2"])
    b2 = jnp.zeros((1, H_PAD), jnp.float32).at[:, :HIDDEN].set(params["b2"])

    wh = jnp.zeros((H_PAD, OUT_PAD), jnp.float32)
    wh = wh.at[:HIDDEN, :action_dim].set(params["wmu"])
    wh = wh.at[:HIDDEN, action_dim:2 * action_dim].set(params["wsig"])
    bh = jnp.zeros((1, OUT_PAD), jnp.float32)
    bh = bh.at[:, :action_dim].set(params["bmu"])
    bh = bh.at[:, action_dim:2 * action_dim].set(params["bsig"])

    return {"w1": w1, "b1": b1, "w2": w2, "b2": b2, "wh": wh, "bh": bh,
            "feature_dim": feature_dim, "f_pad": f_pad,
            "action_dim": action_dim}


def actor_forward(x, packed):
    """x: (B, feature_dim) float32 -> (mu, sigma), each (B, action_dim)."""
    B, F = x.shape
    action_dim = packed["action_dim"]
    f_pad = packed["f_pad"]
    assert F == packed["feature_dim"]

    # Pick a batch tile: small batches -> single sublane-aligned block;
    # large batches -> MAX_BATCH_TILE rows per grid step.
    tb = min(MAX_BATCH_TILE, _round_up(B, SUBLANE))
    b_pad = _round_up(B, tb)
    n_blocks = b_pad // tb

    # Pad x to (b_pad, f_pad) only when needed (zero-copy fast path when the
    # caller already provides conformant shapes). Padded rows/cols are zero,
    # which is harmless and sliced off below.
    x = x.astype(jnp.float32)
    if b_pad == B and f_pad == F:
        x_p = x
    else:
        x_p = jnp.pad(x, ((0, b_pad - B), (0, f_pad - F)))

    w1, b1 = packed["w1"], packed["b1"]
    w2, b2 = packed["w2"], packed["b2"]
    wh, bh = packed["wh"], packed["bh"]

    const2d = lambda a: pl.BlockSpec(a.shape, lambda i: (0, 0))

    flops = 2 * b_pad * (f_pad * H_PAD + H_PAD * H_PAD + H_PAD * OUT_PAD)
    bytes_accessed = 4 * (b_pad * f_pad + b_pad * OUT_PAD
                          + w1.size + b1.size + w2.size + b2.size
                          + wh.size + bh.size)
    transcendentals = 3 * b_pad * OUT_PAD  # tanh + exp + log1p over padded width

    out = pl.pallas_call(
        _make_actor_kernel(action_dim),
        out_shape=jax.ShapeDtypeStruct((b_pad, OUT_PAD), jnp.float32),
        grid=(n_blocks,),
        in_specs=[
            pl.BlockSpec((tb, f_pad), lambda i: (i, 0)),   # x tile per step
            const2d(w1), const2d(b1),                      # weights stay
            const2d(w2), const2d(b2),                      # VMEM-resident
            const2d(wh), const2d(bh),
        ],
        out_specs=pl.BlockSpec((tb, OUT_PAD), lambda i: (i, 0)),
        compiler_params=pltpu.CompilerParams(
            dimension_semantics=("parallel",)),
        cost_estimate=pl.CostEstimate(
            flops=flops, transcendentals=transcendentals,
            bytes_accessed=bytes_accessed),
    )(x_p, w1, b1, w2, b2, wh, bh)

    mu = out[:B, :action_dim]
    sigma = out[:B, action_dim:2 * action_dim]
    return mu, sigma


def init_params(key, feature_dim, action_dim):
    """Logical-shape params mirroring the PyTorch module.

    shared_net linears: uniform(-1/sqrt(fan_in), 1/sqrt(fan_in)) (PyTorch
    default); mu/sigma weights: uniform(-0.001, 0.001) per the nn.init calls.
    Weights stored as (in, out)."""
    ks = jax.random.split(key, 8)

    def lin(kw, kb, fan_in, fan_out):
        bound = 1.0 / jnp.sqrt(jnp.float32(fan_in))
        w = jax.random.uniform(kw, (fan_in, fan_out), jnp.float32, -bound, bound)
        b = jax.random.uniform(kb, (1, fan_out), jnp.float32, -bound, bound)
        return w, b

    w1, b1 = lin(ks[0], ks[1], feature_dim, HIDDEN)
    w2, b2 = lin(ks[2], ks[3], HIDDEN, HIDDEN)

    bbound = 1.0 / jnp.sqrt(jnp.float32(HIDDEN))
    wmu = jax.random.uniform(ks[4], (HIDDEN, action_dim), jnp.float32, -0.001, 0.001)
    bmu = jax.random.uniform(ks[5], (1, action_dim), jnp.float32, -bbound, bbound)
    wsig = jax.random.uniform(ks[6], (HIDDEN, action_dim), jnp.float32, -0.001, 0.001)
    bsig = jax.random.uniform(ks[7], (1, action_dim), jnp.float32, -bbound, bbound)

    return {"w1": w1, "b1": b1, "w2": w2, "b2": b2,
            "wmu": wmu, "bmu": bmu, "wsig": wsig, "bsig": bsig}


def _reference(x, p):
    h = jnp.maximum(x @ p["w1"] + p["b1"], 0.0)
    h = jnp.maximum(h @ p["w2"] + p["b2"], 0.0)
    mu = jnp.tanh(h @ p["wmu"] + p["bmu"])
    sigma = jax.nn.softplus(h @ p["wsig"] + p["bsig"]) + 0.0001
    return mu, sigma


if __name__ == "__main__":
    key = jax.random.PRNGKey(0)
    k_param, k_x = jax.random.split(key)

    batch, feature_dim, action_dim = 4, 8, 3
    params = init_params(k_param, feature_dim, action_dim)
    packed = pack_params(params, feature_dim, action_dim)
    x = jax.random.normal(k_x, (batch, feature_dim), jnp.float32)

    mu, sigma = actor_forward(x, packed)
    jax.block_until_ready((mu, sigma))

    mu_ref, sigma_ref = _reference(x, params)
    assert mu.shape == (batch, action_dim) and sigma.shape == (batch, action_dim)
    assert jnp.allclose(mu, mu_ref, atol=1e-5), "mu mismatch"
    assert jnp.allclose(sigma, sigma_ref, atol=1e-5), "sigma mismatch"
    assert bool(jnp.all(sigma > 0.0)), "sigma must be strictly positive"

    # Also exercise the multi-block / padded-batch path once.
    k_x2 = jax.random.fold_in(k_x, 1)
    x2 = jax.random.normal(k_x2, (37, feature_dim), jnp.float32)
    mu2, sigma2 = actor_forward(x2, packed)
    jax.block_until_ready((mu2, sigma2))
    mu2_ref, sigma2_ref = _reference(x2, params)
    assert jnp.allclose(mu2, mu2_ref, atol=1e-5), "mu mismatch (padded batch)"
    assert jnp.allclose(sigma2, sigma2_ref, atol=1e-5), "sigma mismatch (padded batch)"

    print("KERNEL_OK")
</pallas_src>

<mosaic_0001>
module attributes {stable_mosaic.version = 11 : i64} {
  func.func @actor_kernel(%arg0: i32, %arg1: memref<8x128xf32, #tpu.memory_space<vmem>>, %arg2: memref<128x128xf32, #tpu.memory_space<vmem>>, %arg3: memref<1x128xf32, #tpu.memory_space<vmem>>, %arg4: memref<128x128xf32, #tpu.memory_space<vmem>>, %arg5: memref<1x128xf32, #tpu.memory_space<vmem>>, %arg6: memref<128x128xf32, #tpu.memory_space<vmem>>, %arg7: memref<1x128xf32, #tpu.memory_space<vmem>>, %arg8: memref<8x128xf32, #tpu.memory_space<vmem>>) attributes {dimension_semantics = [#tpu.dimension_semantics<parallel>], iteration_bounds = array<i64: 1>, scalar_prefetch = 0 : i64, scratch_operands = 0 : i64, tpu.core_type = #tpu.core_type<tc>, window_params = [{transform_indices = @transform_0, window_bounds = array<i64: 8, 128>}, {pipeline_mode = #tpu.pipeline_mode<synchronous>, transform_indices = @transform_1, window_bounds = array<i64: 128, 128>}, {pipeline_mode = #tpu.pipeline_mode<synchronous>, transform_indices = @transform_2, window_bounds = array<i64: 1, 128>}, {pipeline_mode = #tpu.pipeline_mode<synchronous>, transform_indices = @transform_3, window_bounds = array<i64: 128, 128>}, {pipeline_mode = #tpu.pipeline_mode<synchronous>, transform_indices = @transform_4, window_bounds = array<i64: 1, 128>}, {pipeline_mode = #tpu.pipeline_mode<synchronous>, transform_indices = @transform_5, window_bounds = array<i64: 128, 128>}, {pipeline_mode = #tpu.pipeline_mode<synchronous>, transform_indices = @transform_6, window_bounds = array<i64: 1, 128>}, {transform_indices = @transform_7, window_bounds = array<i64: 8, 128>}]} {
    %c0 = arith.constant 0 : index
    %c0_0 = arith.constant 0 : index
    %0 = vector.load %arg1[%c0, %c0_0] : memref<8x128xf32, #tpu.memory_space<vmem>>, vector<8x128xf32>
    %c0_1 = arith.constant 0 : index
    %c0_2 = arith.constant 0 : index
    %1 = vector.load %arg2[%c0_1, %c0_2] : memref<128x128xf32, #tpu.memory_space<vmem>>, vector<128x128xf32>
    %cst = arith.constant dense<0.000000e+00> : vector<8x128xf32>
    %2 = tpu.matmul %0, %1, %cst {dimension_numbers = #tpu.dot_dimension_numbers<[1], [0], [0], [1], [0, 0, 1, 1], [], []>} : vector<8x128xf32>, vector<128x128xf32>, vector<8x128xf32> -> vector<8x128xf32>
    %c0_3 = arith.constant 0 : index
    %c0_4 = arith.constant 0 : index
    %3 = vector.load %arg3[%c0_3, %c0_4] : memref<1x128xf32, #tpu.memory_space<vmem>>, vector<1x128xf32>
    %4 = vector.broadcast %3 : vector<1x128xf32> to vector<8x128xf32>
    %5 = arith.addf %2, %4 : vector<8x128xf32>
    %cst_5 = arith.constant 0.000000e+00 : f32
    %6 = vector.broadcast %cst_5 : f32 to vector<8x128xf32>
    %7 = arith.maximumf %5, %6 : vector<8x128xf32>
    %c0_6 = arith.constant 0 : index
    %c0_7 = arith.constant 0 : index
    %8 = vector.load %arg4[%c0_6, %c0_7] : memref<128x128xf32, #tpu.memory_space<vmem>>, vector<128x128xf32>
    %cst_8 = arith.constant dense<0.000000e+00> : vector<8x128xf32>
    %9 = tpu.matmul %7, %8, %cst_8 {dimension_numbers = #tpu.dot_dimension_numbers<[1], [0], [0], [1], [0, 0, 1, 1], [], []>} : vector<8x128xf32>, vector<128x128xf32>, vector<8x128xf32> -> vector<8x128xf32>
    %c0_9 = arith.constant 0 : index
    %c0_10 = arith.constant 0 : index
    %10 = vector.load %arg5[%c0_9, %c0_10] : memref<1x128xf32, #tpu.memory_space<vmem>>, vector<1x128xf32>
    %11 = vector.broadcast %10 : vector<1x128xf32> to vector<8x128xf32>
    %12 = arith.addf %9, %11 : vector<8x128xf32>
    %cst_11 = arith.constant 0.000000e+00 : f32
    %13 = vector.broadcast %cst_11 : f32 to vector<8x128xf32>
    %14 = arith.maximumf %12, %13 : vector<8x128xf32>
    %c0_12 = arith.constant 0 : index
    %c0_13 = arith.constant 0 : index
    %15 = vector.load %arg6[%c0_12, %c0_13] : memref<128x128xf32, #tpu.memory_space<vmem>>, vector<128x128xf32>
    %cst_14 = arith.constant dense<0.000000e+00> : vector<8x128xf32>
    %16 = tpu.matmul %14, %15, %cst_14 {dimension_numbers = #tpu.dot_dimension_numbers<[1], [0], [0], [1], [0, 0, 1, 1], [], []>} : vector<8x128xf32>, vector<128x128xf32>, vector<8x128xf32> -> vector<8x128xf32>
    %c0_15 = arith.constant 0 : index
    %c0_16 = arith.constant 0 : index
    %17 = vector.load %arg7[%c0_15, %c0_16] : memref<1x128xf32, #tpu.memory_space<vmem>>, vector<1x128xf32>
    %18 = vector.broadcast %17 : vector<1x128xf32> to vector<8x128xf32>
    %19 = arith.addf %16, %18 : vector<8x128xf32>
    %20 = tpu.iota {dimensions = array<i32: 1>} : vector<8x128xi32>
    %21 = math.tanh %19 : vector<8x128xf32>
    %cst_17 = arith.constant 2.000000e+01 : f32
    %22 = vector.broadcast %cst_17 : f32 to vector<8x128xf32>
    %23 = arith.cmpf ogt, %19, %22 : vector<8x128xf32>
    %cst_18 = arith.constant 2.000000e+01 : f32
    %24 = vector.broadcast %cst_18 : f32 to vector<8x128xf32>
    %25 = arith.minimumf %19, %24 : vector<8x128xf32>
    %26 = math.exp %25 : vector<8x128xf32>
    %27 = math.log1p %26 : vector<8x128xf32>
    %28 = arith.select %23, %19, %27 : vector<8x128xi1>, vector<8x128xf32>
    %cst_19 = arith.constant 9.99999974E-5 : f32
    %29 = vector.broadcast %cst_19 : f32 to vector<8x128xf32>
    %30 = arith.addf %28, %29 : vector<8x128xf32>
    %c3_i32 = arith.constant 3 : i32
    %31 = vector.broadcast %c3_i32 : i32 to vector<8x128xi32>
    %32 = arith.cmpi slt, %20, %31 : vector<8x128xi32>
    %33 = arith.select %32, %21, %30 : vector<8x128xi1>, vector<8x128xf32>
    %c0_20 = arith.constant 0 : index
    %c0_21 = arith.constant 0 : index
    %34 = vector.load %arg8[%c0_20, %c0_21] : memref<8x128xf32, #tpu.memory_space<vmem>>, vector<8x128xf32>
    tpu.vector_store %arg8[%c0_20, %c0_21], %33 {strides = array<i32>} : memref<8x128xf32, #tpu.memory_space<vmem>>, vector<8x128xf32>,
    return
  }
  func.func @transform_0(%arg0: i32) -> (i32, i32) {
    %c0_i32 = arith.constant 0 : i32
    %c0_i32_0 = arith.constant 0 : i32
    return %arg0, %c0_i32 : i32, i32
  }
  func.func @transform_1(%arg0: i32) -> (i32, i32) {
    %c0_i32 = arith.constant 0 : i32
    %c0_i32_0 = arith.constant 0 : i32
    %c0_i32_1 = arith.constant 0 : i32
    return %c0_i32, %c0_i32_0 : i32, i32
  }
  func.func @transform_2(%arg0: i32) -> (i32, i32) {
    %c0_i32 = arith.constant 0 : i32
    %c0_i32_0 = arith.constant 0 : i32
    %c0_i32_1 = arith.constant 0 : i32
    return %c0_i32, %c0_i32_0 : i32, i32
  }
  func.func @transform_3(%arg0: i32) -> (i32, i32) {
    %c0_i32 = arith.constant 0 : i32
    %c0_i32_0 = arith.constant 0 : i32
    %c0_i32_1 = arith.constant 0 : i32
    return %c0_i32, %c0_i32_0 : i32, i32
  }
  func.func @transform_4(%arg0: i32) -> (i32, i32) {
    %c0_i32 = arith.constant 0 : i32
    %c0_i32_0 = arith.constant 0 : i32
    %c0_i32_1 = arith.constant 0 : i32
    return %c0_i32, %c0_i32_0 : i32, i32
  }
  func.func @transform_5(%arg0: i32) -> (i32, i32) {
    %c0_i32 = arith.constant 0 : i32
    %c0_i32_0 = arith.constant 0 : i32
    %c0_i32_1 = arith.constant 0 : i32
    return %c0_i32, %c0_i32_0 : i32, i32
  }
  func.func @transform_6(%arg0: i32) -> (i32, i32) {
    %c0_i32 = arith.constant 0 : i32
    %c0_i32_0 = arith.constant 0 : i32
    %c0_i32_1 = arith.constant 0 : i32
    return %c0_i32, %c0_i32_0 : i32, i32
  }
  func.func @transform_7(%arg0: i32) -> (i32, i32) {
    %c0_i32 = arith.constant 0 : i32
    %c0_i32_0 = arith.constant 0 : i32
    return %arg0, %c0_i32 : i32, i32
  }
}

</mosaic_0001>

<bundles_post_ra>
// kernel: tpu_custom_call.1
= control target key start
LH: loop header
LB: loop body
LE: loop exit
PB: predicated region body
PF: predicated region fallthrough
CT: control target
= control target key end

     0   :  { %12 = vsyncpa [#allocation3], 0  ;;  %s923_s0 = inlined_call_operand.hbm [shape: f32[8,128], index: 0, kind: input, shape index: {}]   ;;  %s924_s1 = inlined_call_operand.hbm [shape: f32[128,128], index: 1, kind: input, shape index: {}]   ;;  %s925_s2 = inlined_call_operand.vmem [shape: f32[1,128], index: 2, kind: input, shape index: {}]   ;;  %s926_s3 = inlined_call_operand.hbm [shape: f32[128,128], index: 3, kind: input, shape index: {}]   ;;  %s927_s4 = inlined_call_operand.vmem [shape: f32[1,128], index: 4, kind: input, shape index: {}]   ;;  %s928_s5 = inlined_call_operand.hbm [shape: f32[128,128], index: 5, kind: input, shape index: {}]   ;;  %s929_s6 = inlined_call_operand.vmem [shape: f32[1,128], index: 6, kind: input, shape index: {}]   ;;  %s930_s7 = inlined_call_operand.hbm [shape: f32[8,128], index: 7, kind: output, shape index: {}]  }
   0x1   :  { %13 = vsyncpa [#allocation6], 0 }
   0x2   :  { %14 = vsyncpa [#allocation9], 0 }
   0x3   :  { %15 = vsyncpa [#allocation4], 0  ;;  %s765_s24 = smov [#allocation5]   ;;  %s647_s28 = scalar_lea.hbm %s924_s1, 2048 }
   0x4   :  { %s31_s25 = sshll.u32 %s765_s24, 4  ;;  %p648_p0 = scmp.ne.s32.totalorder %s924_s1, %s647_s28  ;;  %s32_s25 = int_to_ptr.vmem [resolvable:$true] %s31_s25 }
   0x5   :  { %p651_p1 = scmp.lt.u32.totalorder %s647_s28, %s924_s1 }
   0x7   :  { %p653_p2 = pnand %p651_p1, %p648_p0 }
   0x9   :  { %656 = shalt.err (!%p653_p2)
}
   0xa   :  { %s657_s10 = scalar_lea.vmem %s32_s25, 2048  ;;  %p662_p4 = scmp.lt.s32.totalorder %s32_s25, %s32_s25 }
   0xb   :  { %p658_p3 = scmp.ne.s32.totalorder %s32_s25, %s657_s10  ;;  %p663_p5 = scmp.lt.s32.totalorder %s657_s10, %s657_s10 }
   0xd   :  { %p664_p6 = por %p663_p5, %p662_p4 }
   0xf   :  { %p665_p7 = pnand %p664_p6, %p658_p3 }
  0x11   :  { %668 = shalt.err (!%p665_p7)
}
  0x12   :  { %s766_s11 = smov 128   ;;  %s767_s12 = smov 8  }
  0x13   :  { %37 = dma.hbm_to_vmem [thread:$0]  %s924_s1, 2048, %s32_s25, [#allocation6], %s766_s11, %s766_s11, %s767_s12  }
  0x14   :  { %s768_s15 = smov [#allocation2]   ;;  %s769_s17 = smov [#allocation7]  }
  0x15   :  { %s22_s16 = sshll.u32 %s768_s15, 4  ;;  %s45_s18 = sshll.u32 %s769_s17, 4  ;;  %s23_s16 = int_to_ptr.vmem [resolvable:$true] %s22_s16  ;;  %s46_s18 = int_to_ptr.vmem [resolvable:$true] %s45_s18 }
  0x16   :  { %s669_s21 = scalar_lea.hbm %s923_s0, 128 }
  0x17   :  { %p670_p8 = scmp.ne.s32.totalorder %s923_s0, %s669_s21  ;;  %p673_p9 = scmp.lt.u32.totalorder %s669_s21, %s923_s0 }
  0x19   :  { %p675_p10 = pnand %p673_p9, %p670_p8 }
  0x1b   :  { %678 = shalt.err (!%p675_p10)
}
  0x1c   :  { %s679_s1 = scalar_lea.vmem %s23_s16, 128  ;;  %p684_p12 = scmp.lt.s32.totalorder %s23_s16, %s23_s16 }
  0x1d   :  { %p680_p11 = scmp.ne.s32.totalorder %s23_s16, %s679_s1  ;;  %p685_p13 = scmp.lt.s32.totalorder %s679_s1, %s679_s1 }
  0x1f   :  { %p686_p0 = por %p685_p13, %p684_p12 }
  0x21   :  { %p687_p1 = pnand %p686_p0, %p680_p11 }
  0x23   :  { %690 = shalt.err (!%p687_p1)
}
  0x24   :  { %25 = dma.hbm_to_vmem [thread:$0]  %s923_s0, 128, %s23_s16, [#allocation3]  }
  0x25   :  { %s691_s30 = scalar_lea.hbm %s926_s3, 2048 }
  0x26   :  { %p692_p2 = scmp.ne.s32.totalorder %s926_s3, %s691_s30  ;;  %p695_p3 = scmp.lt.u32.totalorder %s691_s30, %s926_s3 }
  0x28   :  { %p697_p4 = pnand %p695_p3, %p692_p2 }
  0x2a   :  { %700 = shalt.err (!%p697_p4)
}
  0x2b   :  { %s701_s14 = scalar_lea.vmem %s46_s18, 2048  ;;  %p706_p6 = scmp.lt.s32.totalorder %s46_s18, %s46_s18 }
  0x2c   :  { %p702_p5 = scmp.ne.s32.totalorder %s46_s18, %s701_s14  ;;  %p707_p7 = scmp.lt.s32.totalorder %s701_s14, %s701_s14 }
  0x2e   :  { %p708_p8 = por %p707_p7, %p706_p6 }
  0x30   :  { %p709_p9 = pnand %p708_p8, %p702_p5 }
  0x32   :  { %712 = shalt.err (!%p709_p9)
}
  0x33   :  { %51 = dma.hbm_to_vmem [thread:$0]  %s926_s3, 2048, %s46_s18, [#allocation6], %s766_s11, %s766_s11, %s767_s12  }
  0x34   :  { %s770_s16 = smov [#allocation8]   ;;  %s713_s21 = scalar_lea.hbm %s928_s5, 2048 }
  0x35   :  { %s59_s17 = sshll.u32 %s770_s16, 4  ;;  %p714_p10 = scmp.ne.s32.totalorder %s928_s5, %s713_s21  ;;  %s60_s17 = int_to_ptr.vmem [resolvable:$true] %s59_s17 }
  0x36   :  { %p717_p11 = scmp.lt.u32.totalorder %s713_s21, %s928_s5 }
  0x38   :  { %p719_p12 = pnand %p717_p11, %p714_p10 }
  0x3a   :  { %722 = shalt.err (!%p719_p12)
}
  0x3b   :  { %s723_s1 = scalar_lea.vmem %s60_s17, 2048  ;;  %p728_p0 = scmp.lt.s32.totalorder %s60_s17, %s60_s17 }
  0x3c   :  { %p724_p13 = scmp.ne.s32.totalorder %s60_s17, %s723_s1  ;;  %p729_p1 = scmp.lt.s32.totalorder %s723_s1, %s723_s1 }
  0x3e   :  { %p730_p2 = por %p729_p1, %p728_p0 }
  0x40   :  { %p731_p3 = pnand %p730_p2, %p724_p13 }
  0x42   :  { %734 = shalt.err (!%p731_p3)
}
  0x43   :  { %65 = dma.hbm_to_vmem [thread:$0]  %s928_s5, 2048, %s60_s17, [#allocation9], %s766_s11, %s766_s11, %s767_s12  }
  0x44   :  { %757 = dma.done.wait [#allocation3], 128  }
  0x45   :  { %758 = vsyncadd [#allocation3], 4294967168 }
  0x46   :  { %759 = dma.done.wait [#allocation6], 4096  }
  0x47   :  { %760 = vsyncadd [#allocation6], 4294963200 }
  0x48   :  { %761 = dma.done.wait [#allocation9], 2048  }
  0x49   :  { %762 = vsyncadd [#allocation9], 4294965248  ;;  %v771_v0 = vmov 0.0|0.0   ;;  %vm772_vm0 = vmmov 0   ;;  %v773_v1 = vmov 0.0   ;;  %v81_v2 = vld [vmem:[#allocation5] sm:$0xff] }
  0x4a   :  { %559 = vmatprep.subr.bf16.mxu0 %v771_v0  ;;  %486 = vmatprep.mubr.msk.f32.mxu0 %vm772_vm0, %v773_v1  ;;  %v82_v3 = vld [vmem:[#allocation5 + $0x8] sm:$0xff]  ;;  %v83_v4 = vld [vmem:[#allocation5 + $0x10] sm:$0xff]  ;;  %v84_v6 = vld [vmem:[#allocation5 + $0x18] sm:$0xff] }
  0x4b   :  { %583 = vmatprep.subr.bf16.mxu1 %v771_v0  ;;  %521 = vmatprep.mubr.msk.f32.mxu1 %vm772_vm0, %v773_v1  ;;  %v560_v5 = vpack.c.bf16 %v82_v3, %v81_v2  ;;  %v563_v7 = vpack.c.bf16 %v84_v6, %v83_v4  ;;  %v85_v8 = vld [vmem:[#allocation5 + $0x20] sm:$0xff]  ;;  %v86_v9 = vld [vmem:[#allocation5 + $0x28] sm:$0xff]  ;;  %v177_v12 = vld [vmem:[#allocation7 + $0x10] sm:$0xff] }
  0x4c   :  { %v175_v10 = vld [vmem:[#allocation7] sm:$0xff]  ;;  %v176_v11 = vld [vmem:[#allocation7 + $0x8] sm:$0xff]  ;;  %v178_v13 = vld [vmem:[#allocation7 + $0x18] sm:$0xff]  ;;  %v566_v14 = vpack.c.bf16 %v86_v9, %v85_v8 }
  0x4d   :  { %561 = vmatpush3.bf16.msra.mxu0 %v560_v5  ;;  %v584_v15 = vpack.c.bf16 %v176_v11, %v175_v10  ;;  %v87_v16 = vld [vmem:[#allocation5 + $0x30] sm:$0xff]  ;;  %v88_v17 = vld [vmem:[#allocation5 + $0x38] sm:$0xff]  ;;  %v587_v18 = vpack.c.bf16 %v178_v13, %v177_v12  ;;  %v179_v19 = vld [vmem:[#allocation7 + $0x20] sm:$0xff] }
  0x4e   :  { %562 = vmatprep.subr.bf16.mxu0 %v771_v0  ;;  %v180_v20 = vld [vmem:[#allocation7 + $0x28] sm:$0xff]  ;;  %v569_v21 = vpack.c.bf16 %v88_v17, %v87_v16  ;;  %v89_v22 = vld [vmem:[#allocation5 + $0x40] sm:$0xff]  ;;  %v181_v25 = vld [vmem:[#allocation7 + $0x30] sm:$0xff] }
  0x4f   :  { %585 = vmatpush3.bf16.msra.mxu1 %v584_v15  ;;  %v90_v23 = vld [vmem:[#allocation5 + $0x48] sm:$0xff]  ;;  %v590_v24 = vpack.c.bf16 %v180_v20, %v179_v19  ;;  %v182_v26 = vld [vmem:[#allocation7 + $0x38] sm:$0xff]  ;;  %v91_v28 = vld [vmem:[#allocation5 + $0x50] sm:$0xff] }
  0x50   :  { %586 = vmatprep.subr.bf16.mxu1 %v771_v0  ;;  %v572_v27 = vpack.c.bf16 %v90_v23, %v89_v22  ;;  %v92_v29 = vld [vmem:[#allocation5 + $0x58] sm:$0xff]  ;;  %v593_v30 = vpack.c.bf16 %v182_v26, %v181_v25  ;;  %v183_v31 = vld [vmem:[#allocation7 + $0x40] sm:$0xff]  ;;  %v184_v32 = vld [vmem:[#allocation7 + $0x48] sm:$0xff] }
  0x51   :  { %564 = vmatpush3.bf16.msra.mxu0 %v563_v7  ;;  %v575_v33 = vpack.c.bf16 %v92_v29, %v91_v28  ;;  %v93_v34 = vld [vmem:[#allocation5 + $0x60] sm:$0xff]  ;;  %v94_v35 = vld [vmem:[#allocation5 + $0x68] sm:$0xff]  ;;  %v596_v36 = vpack.c.bf16 %v184_v32, %v183_v31  ;;  %v185_v37 = vld [vmem:[#allocation7 + $0x50] sm:$0xff] }
  0x52   :  { %565 = vmatprep.subr.bf16.mxu0 %v771_v0  ;;  %v186_v38 = vld [vmem:[#allocation7 + $0x58] sm:$0xff]  ;;  %v578_v39 = vpack.c.bf16 %v94_v35, %v93_v34  ;;  %v95_v40 = vld [vmem:[#allocation5 + $0x70] sm:$0xff]  ;;  %v187_v43 = vld [vmem:[#allocation7 + $0x60] sm:$0xff] }
  0x53   :  { %588 = vmatpush3.bf16.msra.mxu1 %v587_v18  ;;  %v96_v41 = vld [vmem:[#allocation5 + $0x78] sm:$0xff]  ;;  %v599_v42 = vpack.c.bf16 %v186_v38, %v185_v37  ;;  %v188_v44 = vld [vmem:[#allocation7 + $0x68] sm:$0xff]  ;;  %v189_v48 = vld [vmem:[#allocation7 + $0x70] sm:$0xff] }
  0x54   :  { %589 = vmatprep.subr.bf16.mxu1 %v771_v0  ;;  %v581_v45 = vpack.c.bf16 %v96_v41, %v95_v40  ;;  %v602_v46 = vpack.c.bf16 %v188_v44, %v187_v43  ;;  %v80_v47 = vld [vmem:[#allocation2] sm:$0xff]  ;;  %v269_v51 = vld [vmem:[#allocation8] sm:$0xff]  ;;  %v270_v52 = vld [vmem:[#allocation8 + $0x8] sm:$0xff] }
  0x55   :  { %567 = vmatpush3.bf16.msra.mxu0 %v566_v14  ;;  %v190_v49 = vld [vmem:[#allocation7 + $0x78] sm:$0xff]  ;;  %v271_v53 = vld [vmem:[#allocation8 + $0x10] sm:$0xff]  ;;  %v608_v54 = vpack.c.bf16 %v270_v52, %v269_v51  ;;  %v273_v57 = vld [vmem:[#allocation8 + $0x20] sm:$0xff] }
  0x56   :  { %568 = vmatprep.subr.bf16.mxu0 %v771_v0  ;;  %v605_v50 = vpack.c.bf16 %v190_v49, %v189_v48  ;;  %v272_v55 = vld [vmem:[#allocation8 + $0x18] sm:$0xff]  ;;  %v274_v58 = vld [vmem:[#allocation8 + $0x28] sm:$0xff]  ;;  %v275_v60 = vld [vmem:[#allocation8 + $0x30] sm:$0xff] }
  0x57   :  { %591 = vmatpush3.bf16.msra.mxu1 %v590_v24  ;;  %v611_v56 = vpack.c.bf16 %v272_v55, %v271_v53  ;;  %v614_v59 = vpack.c.bf16 %v274_v58, %v273_v57  ;;  %v276_v61 = vld [vmem:[#allocation8 + $0x38] sm:$0xff]  ;;  %v277_v63 = vld [vmem:[#allocation8 + $0x40] sm:$0xff]  ;;  %v279_v3 = vld [vmem:[#allocation8 + $0x50] sm:$0xff] }
  0x58   :  { %592 = vmatprep.subr.bf16.mxu1 %v771_v0  ;;  %v617_v62 = vpack.c.bf16 %v276_v61, %v275_v60  ;;  %v280_v4 = vld [vmem:[#allocation8 + $0x58] sm:$0xff]  ;;  %v281_v6 = vld [vmem:[#allocation8 + $0x60] sm:$0xff]  ;;  %v282_v7 = vld [vmem:[#allocation8 + $0x68] sm:$0xff] }
  0x59   :  { %570 = vmatpush3.bf16.msra.mxu0 %v569_v21  ;;  %v623_v5 = vpack.c.bf16 %v280_v4, %v279_v3  ;;  %v626_v8 = vpack.c.bf16 %v282_v7, %v281_v6  ;;  %v400_v9 = vld [vmem:[%s925_s2] ss:$0 sm:$0xff]  ;;  %v283_v14 = vld [vmem:[#allocation8 + $0x70] sm:$0xff] }
  0x5a   :  { %571 = vmatprep.subr.bf16.mxu0 %v771_v0  ;;  %v284_v15 = vld [vmem:[#allocation8 + $0x78] sm:$0xff] }
  0x5b   :  { %594 = vmatpush3.bf16.msra.mxu1 %v593_v30  ;;  %v629_v16 = vpack.c.bf16 %v284_v15, %v283_v14  ;;  %v401_v17 = vld [vmem:[%s927_s4] ss:$0 sm:$0xff]  ;;  %v362_v30 = vlaneseq  ;;  %s774_s4 = smov [#allocation10]  }
  0x5c   :  { %595 = vmatprep.subr.bf16.mxu1 %v771_v0  ;;  %v402_v21 = vld [vmem:[%s929_s6] ss:$0 sm:$0xff]  ;;  %s389_s6 = sshll.u32 %s774_s4, 4  ;;  %s390_s6 = int_to_ptr.vmem [resolvable:$true] %s389_s6 }
  0x5d   :  { %573 = vmatpush3.bf16.msra.mxu0 %v572_v27  ;;  %v363_v34 = vand.u32 127, %v362_v30  ;;  %s735_s28 = scalar_lea.vmem %s390_s6, 128  ;;  %p740_p5 = scmp.lt.s32.totalorder %s390_s6, %s390_s6 }
  0x5e   :  { %574 = vmatprep.subr.bf16.mxu0 %v771_v0  ;;  %p736_p4 = scmp.ne.s32.totalorder %s390_s6, %s735_s28  ;;  %p741_p6 = scmp.lt.s32.totalorder %s735_s28, %s735_s28 }
  0x5f   :  { %597 = vmatpush3.bf16.msra.mxu1 %v596_v36  ;;  %vm380_vm3 = vcmp.lt.s32.totalorder %v363_v34, 3 }
  0x60   :  { %598 = vmatprep.subr.bf16.mxu1 %v771_v0  ;;  %p742_p7 = por %p741_p6, %p740_p5 }
  0x61   :  { %576 = vmatpush3.bf16.msra.mxu0 %v575_v33 }
  0x62   :  { %577 = vmatprep.subr.bf16.mxu0 %v771_v0  ;;  %p743_p8 = pnand %p742_p7, %p736_p4 }
  0x63   :  { %600 = vmatpush3.bf16.msra.mxu1 %v599_v42 }
  0x64   :  { %601 = vmatprep.subr.bf16.mxu1 %v771_v0 }
  0x65   :  { %579 = vmatpush3.bf16.msra.mxu0 %v578_v39 }
  0x66   :  { %580 = vmatprep.subr.bf16.mxu0 %v771_v0 }
  0x67   :  { %603 = vmatpush3.bf16.msra.mxu1 %v602_v46 }
  0x68   :  { %604 = vmatprep.subr.bf16.mxu1 %v771_v0 }
  0x69   :  { %582 = vmatpush3.bf16.msra.mxu0 %v581_v45 }
  0x6a   :  { %607 = vmatprep.subr.bf16.mxu0 %v771_v0 }
  0x6b   :  { %606 = vmatpush3.bf16.msra.mxu1 %v605_v50 }
  0x6c   :  { %487 = vmatmul.mubr.f32.vlgmr.msra.gmra.mrb[0].mxu0 %v80_v47 }
  0x6d   :  { %556 = vmatprep.mubr.msk.f32.mxu0 %vm772_vm0, %v773_v1  ;;  %609 = vmatpush3.bf16.msra.mxu0 %v608_v54  ;;  %v278_v1 = vld [vmem:[#allocation8 + $0x48] sm:$0xff] }
  0x6e   :  { %610 = vmatprep.subr.bf16.mxu0 %v771_v0  ;;  %v620_v2 = vpack.c.bf16 %v278_v1, %v277_v63 }
  0x71   :  { %612 = vmatpush3.bf16.msra.mxu0 %v611_v56 }
  0x72   :  { %613 = vmatprep.subr.bf16.mxu0 %v771_v0 }
  0x75   :  { %615 = vmatpush3.bf16.msra.mxu0 %v614_v59 }
  0x76   :  { %616 = vmatprep.subr.bf16.mxu0 %v771_v0 }
  0x79   :  { %618 = vmatpush3.bf16.msra.mxu0 %v617_v62 }
  0x7a   :  { %619 = vmatprep.subr.bf16.mxu0 %v771_v0 }
  0x7d   :  { %621 = vmatpush3.bf16.msra.mxu0 %v620_v2 }
  0x7e   :  { %622 = vmatprep.subr.bf16.mxu0 %v771_v0 }
  0x81   :  { %624 = vmatpush3.bf16.msra.mxu0 %v623_v5 }
  0x82   :  { %625 = vmatprep.subr.bf16.mxu0 %v771_v0 }
  0x85   :  { %627 = vmatpush3.bf16.msra.mxu0 %v626_v8 }
  0x86   :  { %628 = vmatprep.subr.bf16.mxu0 %v771_v0 }
  0x89   :  { %630 = vmatpush3.bf16.msra.mxu0 %v629_v16 }
 0x13f   :  { %v170_v10 = vpop.f32.mrb[0].mxu0 }
 0x140   :  { %v171_v11 = vadd.f32 %v400_v9, %v170_v10  ;;  %v488_v12 = vpop.f32.mrb[1].mxu0 }
 0x142   :  { %v174_v13 = vmax.f32 %v171_v11, 0.0 }
 0x144   :  { %522 = vmatmul.mubr.f32.vlgmr.msra.gmra.mrb[0].mxu1 %v174_v13 }
 0x217   :  { %v264_v18 = vpop.f32.mrb[0].mxu1 }
 0x218   :  { %v265_v19 = vadd.f32 %v401_v17, %v264_v18  ;;  %v523_v0 = vpop.f32.mrb[1].mxu1 }
 0x21a   :  { %v268_v20 = vmax.f32 %v265_v19, 0.0 }
 0x21c   :  { %557 = vmatmul.mubr.f32.vlgmr.msra.gmra.mrb[2].mxu0 %v268_v20 }
 0x2ef   :  { %v358_v22 = vpop.f32.mrb[2].mxu0 }
 0x2f0   :  { %v359_v23 = vadd.f32 %v402_v21, %v358_v22  ;;  %v558_v24 = vpop.f32.mrb[3].mxu0 }
 0x2f2   :  { %v366_v25 = vmin.f32 %v359_v23, 20.0  ;;  %vm365_vm2 = vcmp.gt.f32.partialorder %v359_v23, 20.0 }
 0x2f4   :  { %v367_v26 = vmul.f32 1.442695, %v366_v25 }
 0x2f6   :  { %641 = vpow2.f32 %v367_v26 }
 0x300   :  { %v642_v27 = vpop.eup %641 }
 0x301   :  { %v369_v28 = vadd.f32 1.0, %v642_v27  ;;  %v372_v29 = vmul.f32 -0.5, %v642_v27  ;;  %v375_v32 = vand.u32 2147483647, %v642_v27 }
 0x303   :  { %643 = vlog2.f32 %v369_v28  ;;  %v373_v31 = vadd.f32 1.0, %v372_v29  ;;  %vm376_vm1 = vcmp.lt.f32.partialorder %v375_v32, 0.0004427343 }
 0x304   :  { %645 = vtanh.f32 %v359_v23 }
 0x305   :  { %v374_v36 = vmul.f32 %v642_v27, %v373_v31 }
 0x30d   :  { %v644_v33 = vpop.eup %643 }
 0x30e   :  { %v371_v35 = vmul.f32 0.6931472, %v644_v33  ;;  %v646_v40 = vpop.eup %645 }
 0x310   :  { %v377_v37 = vsel %vm376_vm1, %v374_v36, %v371_v35 }
 0x311   :  { %v378_v38 = vsel %vm365_vm2, %v359_v23, %v377_v37 }
 0x312   :  { %v379_v39 = vadd.f32 0.0001, %v378_v38 }
 0x314   :  { %v381_v41 = vsel %vm380_vm3, %v646_v40, %v379_v39 }
 0x315   :  { %382 = vst [vmem:[#allocation10] sm:$0xff] %v381_v41 }
 0x316   :  { %746 = shalt.err (!%p743_p8)
}
 0x317   :  { %s747_s8 = scalar_lea.hbm %s930_s7, 128 }
 0x318   :  { %p748_p9 = scmp.ne.s32.totalorder %s930_s7, %s747_s8  ;;  %p751_p10 = scmp.lt.u32.totalorder %s747_s8, %s930_s7 }
 0x31a   :  { %p753_p11 = pnand %p751_p10, %p748_p9 }
 0x31c   :  { %756 = shalt.err (!%p753_p11)
}
 0x31d   :  { %392 = dma.vmem_to_hbm [thread:$0]  %s390_s6, 128, %s930_s7, [#allocation4]  }
 0x31e   :  { %763 = dma.done.wait [#allocation4], 128  }
 0x31f   :  { %764 = vsyncadd [#allocation4], 4294967168 }
 0x320   :  { %396 = vsyncpa [#allocation3], 1 }
 0x321   :  { %397 = vsyncpa [#allocation6], 1 }
 0x322   :  { %398 = vsyncpa [#allocation9], 1 }
 0x323   :  { %399 = vsyncpa [#allocation4], 1 }

</bundles_post_ra>
